<compile_context>
chip_gen: v7x
topology: tpu7x:2x2x1
jax: 0.10.0
libtpu: 0.0.40
codegen_flags: <defaults>
</compile_context>

<pallas_src>
import functools

import jax
import jax.numpy as jnp
from jax.experimental import pallas as pl
from jax.experimental.pallas import tpu as pltpu

LANE = 128
SUBLANE = 8


def _round_up(x, m):
    return (x + m - 1) // m * m


def _vmem_limit_bytes():
    """Per-generation VMEM limit: ~100 MiB on 128-MiB chips (v5e/v6e), ~48 MiB on v7x."""
    cap = None
    try:
        cap = getattr(pltpu.get_tpu_info(), "vmem_capacity_bytes", None)
    except Exception:
        cap = None
    if cap is None:
        return 48 * 1024 * 1024                      # safe everywhere
    if cap >= 96 * 1024 * 1024:
        return 100 * 1024 * 1024                     # v5e / v6e (128 MiB physical)
    return min(48 * 1024 * 1024, int(cap * 3 // 4))  # v7x (64 MiB physical), keep headroom


def ff_global_kernel(x_ref, wa_ref, ba_ref, w2_ref, b2_ref, w3_ref, b3_ref,
                     o_ref, sc_ref, *, h1p):
    cdt = wa_ref.dtype                   # MXU operand dtype (f32 or bf16)
    x = x_ref[...].astype(cdt)           # cast the VMEM tile only (no HBM round trip)

    # Fused first layer + linear shortcut: one MXU pass over x (wa = [w1 | ws]).
    t = jnp.dot(x, wa_ref[...], preferred_element_type=jnp.float32) + ba_ref[...]
    sc_ref[...] = t[:, h1p:]             # park shortcut in VMEM -> short live range
    h = jnp.maximum(t[:, :h1p], 0.0)     # Linear(input, H1) + ReLU

    # Linear(H1, H2) + ReLU
    h = jnp.dot(h.astype(cdt), w2_ref[...], preferred_element_type=jnp.float32) + b2_ref[...]
    h = jnp.maximum(h, 0.0)
    # Linear(H2, O) + ReLU
    h = jnp.dot(h.astype(cdt), w3_ref[...], preferred_element_type=jnp.float32) + b3_ref[...]
    h = jnp.maximum(h, 0.0)

    o_ref[...] = (h + sc_ref[...]).astype(o_ref.dtype)


def prepare_params(params, *, weight_dtype=jnp.float32):
    """One-time weight prep: pad feature dims to multiples of 128 (zero padding is
    numerically exact through bias/ReLU/shortcut), fuse [w1 | ws], cast weights.
    Call once and reuse; the per-forward wrapper then only handles x.
    Use weight_dtype=jnp.bfloat16 for the v6e/v7x MXU fast path (halves weight VMEM)."""
    w1, b1 = params["w1"], params["b1"]
    w2, b2 = params["w2"], params["b2"]
    w3, b3 = params["w3"], params["b3"]
    ws, bs = params["ws"], params["bs"]
    D, H1 = w1.shape
    H2, O = w2.shape[1], w3.shape[1]

    Dp, H1p, H2p, Op = (_round_up(v, LANE) for v in (D, H1, H2, O))

    def pad2(a, r, c):
        a = a.astype(jnp.float32)
        return jnp.pad(a, ((0, r - a.shape[0]), (0, c - a.shape[1])))

    wa = jnp.concatenate([pad2(w1, Dp, H1p), pad2(ws, Dp, Op)], axis=1).astype(weight_dtype)
    ba = jnp.concatenate([pad2(b1, 1, H1p), pad2(bs, 1, Op)], axis=1)  # biases stay f32
    prepared = dict(
        wa=wa, ba=ba,
        w2=pad2(w2, H1p, H2p).astype(weight_dtype), b2=pad2(b2, 1, H2p),
        w3=pad2(w3, H2p, Op).astype(weight_dtype), b3=pad2(b3, 1, Op),
        dims=dict(D=D, O=O, Dp=Dp, H1p=H1p, H2p=H2p, Op=Op),
    )
    # Materialize once so forward calls never re-run the padding/concat in HBM.
    return {k: (jax.block_until_ready(v) if k != "dims" else v) for k, v in prepared.items()}


def _pick_tm(N, Dp, Op, x_itemsize, out_itemsize, weight_bytes, vmem_limit):
    Nr = _round_up(N, SUBLANE)
    if Nr <= 256:
        return Nr                        # single block -> grid=(1,), no pipeline overhead
    budget = int(vmem_limit * 0.8)       # headroom for compiler-internal scratch / sems

    def fits(tm):
        per_tile = (2 * tm * Dp * x_itemsize      # double-buffered x tile
                    + 2 * tm * Op * out_itemsize  # double-buffered out tile
                    + tm * Op * 4)                # f32 shortcut scratch
        return per_tile + weight_bytes <= budget

    cands = [t for t in (1024, 512, 256, 128) if t <= Nr and fits(t)] or [128]
    # Prefer tiles that divide N (no row-pad HBM copy of x) and give an even grid
    # length (balances v7x's 2 TensorCores under "parallel" semantics).
    for t in cands:
        if N % t == 0 and (N // t) % 2 == 0:
            return t
    for t in cands:
        if N % t == 0:
            return t
    return cands[0]


def ff_global(x, prepared, *, tm=None):
    """x: [N, input_dim]. prepared: output of prepare_params()."""
    N, D = x.shape
    dims = prepared["dims"]
    assert D == dims["D"], "input feature dim mismatch with prepared params"
    O, Dp, H1p, H2p, Op = dims["O"], dims["Dp"], dims["H1p"], dims["H2p"], dims["Op"]

    vmem_limit = _vmem_limit_bytes()
    weight_bytes = sum(int(prepared[k].size) * prepared[k].dtype.itemsize
                       for k in ("wa", "ba", "w2", "b2", "w3", "b3"))
    if tm is None:
        tm = _pick_tm(N, Dp, Op, x.dtype.itemsize, x.dtype.itemsize,
                      weight_bytes, vmem_limit)
    tm = _round_up(min(tm, _round_up(N, SUBLANE)), SUBLANE)
    Np = _round_up(N, tm)

    # Only copy x in HBM if padding is actually required.
    xp = x if (Np == N and Dp == D) else jnp.pad(x, ((0, Np - N), (0, Dp - D)))

    grid = (Np // tm,)
    row_map = lambda i: (i, 0)
    full_map = lambda i: (0, 0)          # weights/biases resident across all row tiles

    kernel = functools.partial(ff_global_kernel, h1p=H1p)

    def run(single_buffer_weights):
        wmode = dict(pipeline_mode=pl.Buffered(1)) if single_buffer_weights else {}
        return pl.pallas_call(
            kernel,
            out_shape=jax.ShapeDtypeStruct((Np, Op), x.dtype),
            grid_spec=pltpu.PrefetchScalarGridSpec(
                num_scalar_prefetch=0,
                grid=grid,
                in_specs=[
                    pl.BlockSpec((tm, Dp), row_map),                  # x row tile
                    pl.BlockSpec((Dp, H1p + Op), full_map, **wmode),  # [w1 | ws] fused
                    pl.BlockSpec((1, H1p + Op), full_map, **wmode),   # [b1 | bs] fused
                    pl.BlockSpec((H1p, H2p), full_map, **wmode),      # w2
                    pl.BlockSpec((1, H2p), full_map, **wmode),        # b2
                    pl.BlockSpec((H2p, Op), full_map, **wmode),       # w3
                    pl.BlockSpec((1, Op), full_map, **wmode),         # b3
                ],
                out_specs=pl.BlockSpec((tm, Op), row_map),
                scratch_shapes=[pltpu.VMEM((tm, Op), jnp.float32)],   # shortcut scratch
            ),
            compiler_params=pltpu.CompilerParams(
                dimension_semantics=("parallel",),
                vmem_limit_bytes=vmem_limit,
            ),
        )(xp, prepared["wa"], prepared["ba"], prepared["w2"], prepared["b2"],
          prepared["w3"], prepared["b3"])

    try:
        out = run(single_buffer_weights=True)    # grid-invariant weights: 1 VMEM buffer
    except Exception:
        out = run(single_buffer_weights=False)   # fallback: default double buffering

    if Np != N or Op != O:
        out = out[:N, :O]                        # strip row / lane padding
    return out


def init_params(key, input_dim, h1, h2, out_dim):
    """Deterministic synthetic init (PyTorch-like uniform fan-in scaling)."""
    ks = jax.random.split(key, 8)

    def lin(kw, kb, fan_in, fan_out):
        bound = 1.0 / jnp.sqrt(fan_in)
        w = jax.random.uniform(kw, (fan_in, fan_out), jnp.float32, -bound, bound)
        b = jax.random.uniform(kb, (1, fan_out), jnp.float32, -bound, bound)
        return w, b

    w1, b1 = lin(ks[0], ks[1], input_dim, h1)
    w2, b2 = lin(ks[2], ks[3], h1, h2)
    w3, b3 = lin(ks[4], ks[5], h2, out_dim)
    ws, bs = lin(ks[6], ks[7], input_dim, out_dim)
    return dict(w1=w1, b1=b1, w2=w2, b2=b2, w3=w3, b3=b3, ws=ws, bs=bs)


def ff_global_ref(x, p):
    relu = lambda v: jnp.maximum(v, 0.0)
    h = relu(x @ p["w1"] + p["b1"])
    h = relu(h @ p["w2"] + p["b2"])
    h = relu(h @ p["w3"] + p["b3"])
    return h + (x @ p["ws"] + p["bs"])


if __name__ == "__main__":
    # Small shapes consistent with the module's forward:
    # batch=16, input_dim=32, FF_hidden1=64, FF_hidden2=64, FF_output=32
    N, D, H1, H2, O = 16, 32, 64, 64, 32

    key = jax.random.PRNGKey(0)
    kx, kp = jax.random.split(key)
    x = jax.random.normal(kx, (N, D), dtype=jnp.float32)
    params = init_params(kp, D, H1, H2, O)

    prepared = prepare_params(params)        # one-time weight prep (hoisted out of forward)
    out = jax.block_until_ready(ff_global(x, prepared))

    ref = ff_global_ref(x, params)
    assert out.shape == (N, O)
    assert out.dtype == x.dtype
    assert jnp.allclose(out, ref, atol=1e-4, rtol=1e-4)

    print("KERNEL_OK")
</pallas_src>

<mosaic_0001>
module attributes {stable_mosaic.version = 11 : i64} {
  func.func @ff_global_kernel(%arg0: i32, %arg1: memref<16x128xf32, #tpu.memory_space<vmem>>, %arg2: memref<128x256xf32, #tpu.memory_space<vmem>>, %arg3: memref<1x256xf32, #tpu.memory_space<vmem>>, %arg4: memref<128x128xf32, #tpu.memory_space<vmem>>, %arg5: memref<1x128xf32, #tpu.memory_space<vmem>>, %arg6: memref<128x128xf32, #tpu.memory_space<vmem>>, %arg7: memref<1x128xf32, #tpu.memory_space<vmem>>, %arg8: memref<16x128xf32, #tpu.memory_space<vmem>>, %arg9: memref<16x128xf32, #tpu.memory_space<vmem>>) attributes {dimension_semantics = [#tpu.dimension_semantics<parallel>], iteration_bounds = array<i64: 1>, scalar_prefetch = 0 : i64, scratch_operands = 1 : i64, tpu.core_type = #tpu.core_type<tc>, window_params = [{transform_indices = @transform_0, window_bounds = array<i64: 16, 128>}, {pipeline_mode = #tpu.pipeline_mode<synchronous>, transform_indices = @transform_1, window_bounds = array<i64: 128, 256>}, {pipeline_mode = #tpu.pipeline_mode<synchronous>, transform_indices = @transform_2, window_bounds = array<i64: 1, 256>}, {pipeline_mode = #tpu.pipeline_mode<synchronous>, transform_indices = @transform_3, window_bounds = array<i64: 128, 128>}, {pipeline_mode = #tpu.pipeline_mode<synchronous>, transform_indices = @transform_4, window_bounds = array<i64: 1, 128>}, {pipeline_mode = #tpu.pipeline_mode<synchronous>, transform_indices = @transform_5, window_bounds = array<i64: 128, 128>}, {pipeline_mode = #tpu.pipeline_mode<synchronous>, transform_indices = @transform_6, window_bounds = array<i64: 1, 128>}, {transform_indices = @transform_7, window_bounds = array<i64: 16, 128>}]} {
    %c0 = arith.constant 0 : index
    %c0_0 = arith.constant 0 : index
    %0 = vector.load %arg1[%c0, %c0_0] : memref<16x128xf32, #tpu.memory_space<vmem>>, vector<16x128xf32>
    %c0_1 = arith.constant 0 : index
    %c0_2 = arith.constant 0 : index
    %1 = vector.load %arg2[%c0_1, %c0_2] : memref<128x256xf32, #tpu.memory_space<vmem>>, vector<128x256xf32>
    %cst = arith.constant dense<0.000000e+00> : vector<16x256xf32>
    %2 = tpu.matmul %0, %1, %cst {dimension_numbers = #tpu.dot_dimension_numbers<[1], [0], [0], [1], [0, 0, 1, 1], [], []>} : vector<16x128xf32>, vector<128x256xf32>, vector<16x256xf32> -> vector<16x256xf32>
    %c0_3 = arith.constant 0 : index
    %c0_4 = arith.constant 0 : index
    %3 = vector.load %arg3[%c0_3, %c0_4] : memref<1x256xf32, #tpu.memory_space<vmem>>, vector<1x256xf32>
    %4 = vector.broadcast %3 : vector<1x256xf32> to vector<16x256xf32>
    %5 = arith.addf %2, %4 : vector<16x256xf32>
    %6 = vector.extract_strided_slice %5 {offsets = [0, 128], sizes = [16, 128], strides = [1, 1]} : vector<16x256xf32> to vector<16x128xf32>
    %c0_5 = arith.constant 0 : index
    %c0_6 = arith.constant 0 : index
    %7 = vector.load %arg9[%c0_5, %c0_6] : memref<16x128xf32, #tpu.memory_space<vmem>>, vector<16x128xf32>
    tpu.vector_store %arg9[%c0_5, %c0_6], %6 {strides = array<i32>} : memref<16x128xf32, #tpu.memory_space<vmem>>, vector<16x128xf32>,
    %8 = vector.extract_strided_slice %5 {offsets = [0, 0], sizes = [16, 128], strides = [1, 1]} : vector<16x256xf32> to vector<16x128xf32>
    %cst_7 = arith.constant 0.000000e+00 : f32
    %9 = vector.broadcast %cst_7 : f32 to vector<16x128xf32>
    %10 = arith.maximumf %8, %9 : vector<16x128xf32>
    %c0_8 = arith.constant 0 : index
    %c0_9 = arith.constant 0 : index
    %11 = vector.load %arg4[%c0_8, %c0_9] : memref<128x128xf32, #tpu.memory_space<vmem>>, vector<128x128xf32>
    %cst_10 = arith.constant dense<0.000000e+00> : vector<16x128xf32>
    %12 = tpu.matmul %10, %11, %cst_10 {dimension_numbers = #tpu.dot_dimension_numbers<[1], [0], [0], [1], [0, 0, 1, 1], [], []>} : vector<16x128xf32>, vector<128x128xf32>, vector<16x128xf32> -> vector<16x128xf32>
    %c0_11 = arith.constant 0 : index
    %c0_12 = arith.constant 0 : index
    %13 = vector.load %arg5[%c0_11, %c0_12] : memref<1x128xf32, #tpu.memory_space<vmem>>, vector<1x128xf32>
    %14 = vector.broadcast %13 : vector<1x128xf32> to vector<16x128xf32>
    %15 = arith.addf %12, %14 : vector<16x128xf32>
    %cst_13 = arith.constant 0.000000e+00 : f32
    %16 = vector.broadcast %cst_13 : f32 to vector<16x128xf32>
    %17 = arith.maximumf %15, %16 : vector<16x128xf32>
    %c0_14 = arith.constant 0 : index
    %c0_15 = arith.constant 0 : index
    %18 = vector.load %arg6[%c0_14, %c0_15] : memref<128x128xf32, #tpu.memory_space<vmem>>, vector<128x128xf32>
    %cst_16 = arith.constant dense<0.000000e+00> : vector<16x128xf32>
    %19 = tpu.matmul %17, %18, %cst_16 {dimension_numbers = #tpu.dot_dimension_numbers<[1], [0], [0], [1], [0, 0, 1, 1], [], []>} : vector<16x128xf32>, vector<128x128xf32>, vector<16x128xf32> -> vector<16x128xf32>
    %c0_17 = arith.constant 0 : index
    %c0_18 = arith.constant 0 : index
    %20 = vector.load %arg7[%c0_17, %c0_18] : memref<1x128xf32, #tpu.memory_space<vmem>>, vector<1x128xf32>
    %21 = vector.broadcast %20 : vector<1x128xf32> to vector<16x128xf32>
    %22 = arith.addf %19, %21 : vector<16x128xf32>
    %cst_19 = arith.constant 0.000000e+00 : f32
    %23 = vector.broadcast %cst_19 : f32 to vector<16x128xf32>
    %24 = arith.maximumf %22, %23 : vector<16x128xf32>
    %c0_20 = arith.constant 0 : index
    %c0_21 = arith.constant 0 : index
    %25 = vector.load %arg9[%c0_20, %c0_21] : memref<16x128xf32, #tpu.memory_space<vmem>>, vector<16x128xf32>
    %26 = arith.addf %24, %25 : vector<16x128xf32>
    %c0_22 = arith.constant 0 : index
    %c0_23 = arith.constant 0 : index
    %27 = vector.load %arg8[%c0_22, %c0_23] : memref<16x128xf32, #tpu.memory_space<vmem>>, vector<16x128xf32>
    tpu.vector_store %arg8[%c0_22, %c0_23], %26 {strides = array<i32>} : memref<16x128xf32, #tpu.memory_space<vmem>>, vector<16x128xf32>,
    return
  }
  func.func @transform_0(%arg0: i32) -> (i32, i32) {
    %c0_i32 = arith.constant 0 : i32
    %c0_i32_0 = arith.constant 0 : i32
    return %arg0, %c0_i32 : i32, i32
  }
  func.func @transform_1(%arg0: i32) -> (i32, i32) {
    %c0_i32 = arith.constant 0 : i32
    %c0_i32_0 = arith.constant 0 : i32
    %c0_i32_1 = arith.constant 0 : i32
    return %c0_i32, %c0_i32_0 : i32, i32
  }
  func.func @transform_2(%arg0: i32) -> (i32, i32) {
    %c0_i32 = arith.constant 0 : i32
    %c0_i32_0 = arith.constant 0 : i32
    %c0_i32_1 = arith.constant 0 : i32
    return %c0_i32, %c0_i32_0 : i32, i32
  }
  func.func @transform_3(%arg0: i32) -> (i32, i32) {
    %c0_i32 = arith.constant 0 : i32
    %c0_i32_0 = arith.constant 0 : i32
    %c0_i32_1 = arith.constant 0 : i32
    return %c0_i32, %c0_i32_0 : i32, i32
  }
  func.func @transform_4(%arg0: i32) -> (i32, i32) {
    %c0_i32 = arith.constant 0 : i32
    %c0_i32_0 = arith.constant 0 : i32
    %c0_i32_1 = arith.constant 0 : i32
    return %c0_i32, %c0_i32_0 : i32, i32
  }
  func.func @transform_5(%arg0: i32) -> (i32, i32) {
    %c0_i32 = arith.constant 0 : i32
    %c0_i32_0 = arith.constant 0 : i32
    %c0_i32_1 = arith.constant 0 : i32
    return %c0_i32, %c0_i32_0 : i32, i32
  }
  func.func @transform_6(%arg0: i32) -> (i32, i32) {
    %c0_i32 = arith.constant 0 : i32
    %c0_i32_0 = arith.constant 0 : i32
    %c0_i32_1 = arith.constant 0 : i32
    return %c0_i32, %c0_i32_0 : i32, i32
  }
  func.func @transform_7(%arg0: i32) -> (i32, i32) {
    %c0_i32 = arith.constant 0 : i32
    %c0_i32_0 = arith.constant 0 : i32
    return %arg0, %c0_i32 : i32, i32
  }
}

module attributes {stable_mosaic.version = 11 : i64} {
  func.func @ff_global_kernel(%arg0: i32, %arg1: memref<16x128xf32, #tpu.memory_space<vmem>>, %arg2: memref<128x256xf32, #tpu.memory_space<vmem>>, %arg3: memref<1x256xf32, #tpu.memory_space<vmem>>, %arg4: memref<128x128xf32, #tpu.memory_space<vmem>>, %arg5: memref<1x128xf32, #tpu.memory_space<vmem>>, %arg6: memref<128x128xf32, #tpu.memory_space<vmem>>, %arg7: memref<1x128xf32, #tpu.memory_space<vmem>>, %arg8: memref<16x128xf32, #tpu.memory_space<vmem>>, %arg9: memref<16x128xf32, #tpu.memory_space<vmem>>) attributes {dimension_semantics = [#tpu.dimension_semantics<parallel>], iteration_bounds = array<i64: 1>, scalar_prefetch = 0 : i64, scratch_operands = 1 : i64, tpu.core_type = #tpu.core_type<tc>, window_params = [{transform_indices = @transform_0, window_bounds = array<i64: 16, 128>}, {pipeline_mode = #tpu.pipeline_mode<synchronous>, transform_indices = @transform_1, window_bounds = array<i64: 128, 256>}, {pipeline_mode = #tpu.pipeline_mode<synchronous>, transform_indices = @transform_2, window_bounds = array<i64: 1, 256>}, {pipeline_mode = #tpu.pipeline_mode<synchronous>, transform_indices = @transform_3, window_bounds = array<i64: 128, 128>}, {pipeline_mode = #tpu.pipeline_mode<synchronous>, transform_indices = @transform_4, window_bounds = array<i64: 1, 128>}, {pipeline_mode = #tpu.pipeline_mode<synchronous>, transform_indices = @transform_5, window_bounds = array<i64: 128, 128>}, {pipeline_mode = #tpu.pipeline_mode<synchronous>, transform_indices = @transform_6, window_bounds = array<i64: 1, 128>}, {transform_indices = @transform_7, window_bounds = array<i64: 16, 128>}]} {
    %c0 = arith.constant 0 : index
    %c0_0 = arith.constant 0 : index
    %0 = vector.load %arg1[%c0, %c0_0] : memref<16x128xf32, #tpu.memory_space<vmem>>, vector<16x128xf32>
    %c0_1 = arith.constant 0 : index
    %c0_2 = arith.constant 0 : index
    %1 = vector.load %arg2[%c0_1, %c0_2] : memref<128x256xf32, #tpu.memory_space<vmem>>, vector<128x256xf32>
    %cst = arith.constant dense<0.000000e+00> : vector<16x256xf32>
    %2 = tpu.matmul %0, %1, %cst {dimension_numbers = #tpu.dot_dimension_numbers<[1], [0], [0], [1], [0, 0, 1, 1], [], []>} : vector<16x128xf32>, vector<128x256xf32>, vector<16x256xf32> -> vector<16x256xf32>
    %c0_3 = arith.constant 0 : index
    %c0_4 = arith.constant 0 : index
    %3 = vector.load %arg3[%c0_3, %c0_4] : memref<1x256xf32, #tpu.memory_space<vmem>>, vector<1x256xf32>
    %4 = vector.broadcast %3 : vector<1x256xf32> to vector<16x256xf32>
    %5 = arith.addf %2, %4 : vector<16x256xf32>
    %6 = vector.extract_strided_slice %5 {offsets = [0, 128], sizes = [16, 128], strides = [1, 1]} : vector<16x256xf32> to vector<16x128xf32>
    %c0_5 = arith.constant 0 : index
    %c0_6 = arith.constant 0 : index
    %7 = vector.load %arg9[%c0_5, %c0_6] : memref<16x128xf32, #tpu.memory_space<vmem>>, vector<16x128xf32>
    tpu.vector_store %arg9[%c0_5, %c0_6], %6 {strides = array<i32>} : memref<16x128xf32, #tpu.memory_space<vmem>>, vector<16x128xf32>,
    %8 = vector.extract_strided_slice %5 {offsets = [0, 0], sizes = [16, 128], strides = [1, 1]} : vector<16x256xf32> to vector<16x128xf32>
    %cst_7 = arith.constant 0.000000e+00 : f32
    %9 = vector.broadcast %cst_7 : f32 to vector<16x128xf32>
    %10 = arith.maximumf %8, %9 : vector<16x128xf32>
    %c0_8 = arith.constant 0 : index
    %c0_9 = arith.constant 0 : index
    %11 = vector.load %arg4[%c0_8, %c0_9] : memref<128x128xf32, #tpu.memory_space<vmem>>, vector<128x128xf32>
    %cst_10 = arith.constant dense<0.000000e+00> : vector<16x128xf32>
    %12 = tpu.matmul %10, %11, %cst_10 {dimension_numbers = #tpu.dot_dimension_numbers<[1], [0], [0], [1], [0, 0, 1, 1], [], []>} : vector<16x128xf32>, vector<128x128xf32>, vector<16x128xf32> -> vector<16x128xf32>
    %c0_11 = arith.constant 0 : index
    %c0_12 = arith.constant 0 : index
    %13 = vector.load %arg5[%c0_11, %c0_12] : memref<1x128xf32, #tpu.memory_space<vmem>>, vector<1x128xf32>
    %14 = vector.broadcast %13 : vector<1x128xf32> to vector<16x128xf32>
    %15 = arith.addf %12, %14 : vector<16x128xf32>
    %cst_13 = arith.constant 0.000000e+00 : f32
    %16 = vector.broadcast %cst_13 : f32 to vector<16x128xf32>
    %17 = arith.maximumf %15, %16 : vector<16x128xf32>
    %c0_14 = arith.constant 0 : index
    %c0_15 = arith.constant 0 : index
    %18 = vector.load %arg6[%c0_14, %c0_15] : memref<128x128xf32, #tpu.memory_space<vmem>>, vector<128x128xf32>
    %cst_16 = arith.constant dense<0.000000e+00> : vector<16x128xf32>
    %19 = tpu.matmul %17, %18, %cst_16 {dimension_numbers = #tpu.dot_dimension_numbers<[1], [0], [0], [1], [0, 0, 1, 1], [], []>} : vector<16x128xf32>, vector<128x128xf32>, vector<16x128xf32> -> vector<16x128xf32>
    %c0_17 = arith.constant 0 : index
    %c0_18 = arith.constant 0 : index
    %20 = vector.load %arg7[%c0_17, %c0_18] : memref<1x128xf32, #tpu.memory_space<vmem>>, vector<1x128xf32>
    %21 = vector.broadcast %20 : vector<1x128xf32> to vector<16x128xf32>
    %22 = arith.addf %19, %21 : vector<16x128xf32>
    %cst_19 = arith.constant 0.000000e+00 : f32
    %23 = vector.broadcast %cst_19 : f32 to vector<16x128xf32>
    %24 = arith.maximumf %22, %23 : vector<16x128xf32>
    %c0_20 = arith.constant 0 : index
    %c0_21 = arith.constant 0 : index
    %25 = vector.load %arg9[%c0_20, %c0_21] : memref<16x128xf32, #tpu.memory_space<vmem>>, vector<16x128xf32>
    %26 = arith.addf %24, %25 : vector<16x128xf32>
    %c0_22 = arith.constant 0 : index
    %c0_23 = arith.constant 0 : index
    %27 = vector.load %arg8[%c0_22, %c0_23] : memref<16x128xf32, #tpu.memory_space<vmem>>, vector<16x128xf32>
    tpu.vector_store %arg8[%c0_22, %c0_23], %26 {strides = array<i32>} : memref<16x128xf32, #tpu.memory_space<vmem>>, vector<16x128xf32>,
    return
  }
  func.func @transform_0(%arg0: i32) -> (i32, i32) {
    %c0_i32 = arith.constant 0 : i32
    %c0_i32_0 = arith.constant 0 : i32
    return %arg0, %c0_i32 : i32, i32
  }
  func.func @transform_1(%arg0: i32) -> (i32, i32) {
    %c0_i32 = arith.constant 0 : i32
    %c0_i32_0 = arith.constant 0 : i32
    %c0_i32_1 = arith.constant 0 : i32
    return %c0_i32, %c0_i32_0 : i32, i32
  }
  func.func @transform_2(%arg0: i32) -> (i32, i32) {
    %c0_i32 = arith.constant 0 : i32
    %c0_i32_0 = arith.constant 0 : i32
    %c0_i32_1 = arith.constant 0 : i32
    return %c0_i32, %c0_i32_0 : i32, i32
  }
  func.func @transform_3(%arg0: i32) -> (i32, i32) {
    %c0_i32 = arith.constant 0 : i32
    %c0_i32_0 = arith.constant 0 : i32
    %c0_i32_1 = arith.constant 0 : i32
    return %c0_i32, %c0_i32_0 : i32, i32
  }
  func.func @transform_4(%arg0: i32) -> (i32, i32) {
    %c0_i32 = arith.constant 0 : i32
    %c0_i32_0 = arith.constant 0 : i32
    %c0_i32_1 = arith.constant 0 : i32
    return %c0_i32, %c0_i32_0 : i32, i32
  }
  func.func @transform_5(%arg0: i32) -> (i32, i32) {
    %c0_i32 = arith.constant 0 : i32
    %c0_i32_0 = arith.constant 0 : i32
    %c0_i32_1 = arith.constant 0 : i32
    return %c0_i32, %c0_i32_0 : i32, i32
  }
  func.func @transform_6(%arg0: i32) -> (i32, i32) {
    %c0_i32 = arith.constant 0 : i32
    %c0_i32_0 = arith.constant 0 : i32
    %c0_i32_1 = arith.constant 0 : i32
    return %c0_i32, %c0_i32_0 : i32, i32
  }
  func.func @transform_7(%arg0: i32) -> (i32, i32) {
    %c0_i32 = arith.constant 0 : i32
    %c0_i32_0 = arith.constant 0 : i32
    return %arg0, %c0_i32 : i32, i32
  }
}

</mosaic_0001>

<bundles_post_ra>
// kernel: tpu_custom_call.1
= control target key start
LH: loop header
LB: loop body
LE: loop exit
PB: predicated region body
PF: predicated region fallthrough
CT: control target
= control target key end

     0   :  { %12 = vsyncpa [#allocation4], 0  ;;  %s906_s0 = inlined_call_operand.hbm [shape: f32[16,128], index: 0, kind: input, shape index: {}]   ;;  %s907_s1 = inlined_call_operand.hbm [shape: f32[128,256], index: 1, kind: input, shape index: {}]   ;;  %s908_s2 = inlined_call_operand.vmem [shape: f32[1,256], index: 2, kind: input, shape index: {}]   ;;  %s909_s3 = inlined_call_operand.hbm [shape: f32[128,128], index: 3, kind: input, shape index: {}]   ;;  %s910_s4 = inlined_call_operand.vmem [shape: f32[1,128], index: 4, kind: input, shape index: {}]   ;;  %s911_s5 = inlined_call_operand.hbm [shape: f32[128,128], index: 5, kind: input, shape index: {}]   ;;  %s912_s6 = inlined_call_operand.vmem [shape: f32[1,128], index: 6, kind: input, shape index: {}]   ;;  %s913_s7 = inlined_call_operand.hbm [shape: f32[16,128], index: 7, kind: output, shape index: {}]  }
   0x1   :  { %13 = vsyncpa [#allocation7], 0 }
   0x2   :  { %14 = vsyncpa [#allocation10], 0 }
   0x3   :  { %15 = vsyncpa [#allocation5], 0  ;;  %s766_s24 = smov [#allocation6]   ;;  %s648_s28 = scalar_lea.hbm %s907_s1, 4096 }
   0x4   :  { %s33_s25 = sshll.u32 %s766_s24, 4  ;;  %p649_p0 = scmp.ne.s32.totalorder %s907_s1, %s648_s28  ;;  %s34_s25 = int_to_ptr.vmem [resolvable:$true] %s33_s25 }
   0x5   :  { %p652_p1 = scmp.lt.u32.totalorder %s648_s28, %s907_s1 }
   0x7   :  { %p654_p2 = pnand %p652_p1, %p649_p0 }
   0x9   :  { %657 = shalt.err (!%p654_p2)
}
   0xa   :  { %s658_s10 = scalar_lea.vmem %s34_s25, 4096  ;;  %p663_p4 = scmp.lt.s32.totalorder %s34_s25, %s34_s25 }
   0xb   :  { %p659_p3 = scmp.ne.s32.totalorder %s34_s25, %s658_s10  ;;  %p664_p5 = scmp.lt.s32.totalorder %s658_s10, %s658_s10 }
   0xd   :  { %p665_p6 = por %p664_p5, %p663_p4 }
   0xf   :  { %p666_p7 = pnand %p665_p6, %p659_p3 }
  0x11   :  { %669 = shalt.err (!%p666_p7)
}
  0x12   :  { %s767_s11 = smov 256   ;;  %s768_s12 = smov 16  }
  0x13   :  { %39 = dma.hbm_to_vmem [thread:$0]  %s907_s1, 4096, %s34_s25, [#allocation7], %s767_s11, %s767_s11, %s768_s12  }
  0x14   :  { %s769_s15 = smov [#allocation3]   ;;  %s670_s19 = scalar_lea.hbm %s906_s0, 256 }
  0x15   :  { %s21_s16 = sshll.u32 %s769_s15, 4  ;;  %p671_p8 = scmp.ne.s32.totalorder %s906_s0, %s670_s19  ;;  %s22_s16 = int_to_ptr.vmem [resolvable:$true] %s21_s16 }
  0x16   :  { %p674_p9 = scmp.lt.u32.totalorder %s670_s19, %s906_s0 }
  0x18   :  { %p676_p10 = pnand %p674_p9, %p671_p8 }
  0x1a   :  { %679 = shalt.err (!%p676_p10)
}
  0x1b   :  { %s680_s24 = scalar_lea.vmem %s22_s16, 256  ;;  %p685_p12 = scmp.lt.s32.totalorder %s22_s16, %s22_s16 }
  0x1c   :  { %p681_p11 = scmp.ne.s32.totalorder %s22_s16, %s680_s24  ;;  %p686_p13 = scmp.lt.s32.totalorder %s680_s24, %s680_s24 }
  0x1e   :  { %p687_p0 = por %p686_p13, %p685_p12 }
  0x20   :  { %p688_p1 = pnand %p687_p0, %p681_p11 }
  0x22   :  { %691 = shalt.err (!%p688_p1)
}
  0x23   :  { %s770_s1 = smov 128   ;;  %s771_s25 = smov 8  }
  0x24   :  { %27 = dma.hbm_to_vmem [thread:$0]  %s906_s0, 256, %s22_s16, [#allocation4], %s770_s1, %s770_s1, %s771_s25  }
  0x25   :  { %s772_s28 = smov [#allocation8]   ;;  %s773_s30 = smov [#allocation9]  }
  0x26   :  { %s47_s29 = sshll.u32 %s772_s28, 4  ;;  %s61_s8 = sshll.u32 %s773_s30, 4  ;;  %s48_s29 = int_to_ptr.vmem [resolvable:$true] %s47_s29  ;;  %s843_s8 = int_to_ptr.vmem [resolvable:$true] %s61_s8 }
  0x27   :  { %s692_s11 = scalar_lea.hbm %s909_s3, 2048 }
  0x28   :  { %p693_p2 = scmp.ne.s32.totalorder %s909_s3, %s692_s11  ;;  %p696_p3 = scmp.lt.u32.totalorder %s692_s11, %s909_s3 }
  0x2a   :  { %p698_p4 = pnand %p696_p3, %p693_p2 }
  0x2c   :  { %701 = shalt.err (!%p698_p4)
}
  0x2d   :  { %s702_s0 = scalar_lea.vmem %s48_s29, 2048  ;;  %p707_p6 = scmp.lt.s32.totalorder %s48_s29, %s48_s29 }
  0x2e   :  { %p703_p5 = scmp.ne.s32.totalorder %s48_s29, %s702_s0  ;;  %p708_p7 = scmp.lt.s32.totalorder %s702_s0, %s702_s0 }
  0x30   :  { %p709_p8 = por %p708_p7, %p707_p6 }
  0x32   :  { %p710_p9 = pnand %p709_p8, %p703_p5 }
  0x34   :  { %713 = shalt.err (!%p710_p9)
}
  0x35   :  { %53 = dma.hbm_to_vmem [thread:$0]  %s909_s3, 2048, %s48_s29, [#allocation7], %s770_s1, %s770_s1, %s771_s25  }
  0x36   :  { %s714_s20 = scalar_lea.hbm %s911_s5, 2048 }
  0x37   :  { %p715_p10 = scmp.ne.s32.totalorder %s911_s5, %s714_s20  ;;  %p718_p11 = scmp.lt.u32.totalorder %s714_s20, %s911_s5 }
  0x39   :  { %p720_p12 = pnand %p718_p11, %p715_p10 }
  0x3b   :  { %723 = shalt.err (!%p720_p12)
}
  0x3c   :  { %s724_s26 = scalar_lea.vmem %s843_s8, 2048  ;;  %p729_p0 = scmp.lt.s32.totalorder %s843_s8, %s843_s8 }
  0x3d   :  { %p725_p13 = scmp.ne.s32.totalorder %s843_s8, %s724_s26  ;;  %p730_p1 = scmp.lt.s32.totalorder %s724_s26, %s724_s26 }
  0x3f   :  { %p731_p2 = por %p730_p1, %p729_p0 }
  0x41   :  { %p732_p3 = pnand %p731_p2, %p725_p13 }
  0x43   :  { %735 = shalt.err (!%p732_p3)
}
  0x44   :  { %67 = dma.hbm_to_vmem [thread:$0]  %s911_s5, 2048, %s843_s8, [#allocation10], %s770_s1, %s770_s1, %s771_s25  }
  0x45   :  { %758 = dma.done.wait [#allocation4], 256  }
  0x46   :  { %759 = vsyncadd [#allocation4], 4294967040 }
  0x47   :  { %760 = dma.done.wait [#allocation7], 6144  }
  0x48   :  { %761 = vsyncadd [#allocation7], 4294961152 }
  0x49   :  { %762 = dma.done.wait [#allocation10], 2048  }
  0x4a   :  { %763 = vsyncadd [#allocation10], 4294965248  ;;  %v774_v0 = vmov 0.0   ;;  %v85_v1 = vld [vmem:[#allocation6 + $0x8] sm:$0xff]  ;;  %v87_v2 = vld [vmem:[#allocation6 + $0x18] sm:$0xff]  ;;  %s775_s9 = smov [#allocation11]  }
  0x4b   :  { %192 = vmatprep.mubr.f32.mxu0 %v774_v0  ;;  %v84_v3 = vld [vmem:[#allocation6] sm:$0xff]  ;;  %v542_v4 = vpack.c.bf16 %v87_v2, %v85_v1  ;;  %v86_v5 = vld [vmem:[#allocation6 + $0x10] sm:$0xff]  ;;  %v89_v6 = vld [vmem:[#allocation6 + $0x28] sm:$0xff]  ;;  %s420_s10 = sshll.u32 %s775_s9, 4  ;;  %s421_s10 = int_to_ptr.vmem [resolvable:$true] %s420_s10 }
  0x4c   :  { %v91_v7 = vld [vmem:[#allocation6 + $0x38] sm:$0xff]  ;;  %v544_v8 = vpack.c.bf16 %v86_v5, %v84_v3  ;;  %v88_v10 = vld [vmem:[#allocation6 + $0x20] sm:$0xff]  ;;  %v90_v11 = vld [vmem:[#allocation6 + $0x30] sm:$0xff]  ;;  %p741_p5 = scmp.lt.s32.totalorder %s421_s10, %s421_s10 }
  0x4d   :  { %v546_v9 = vpack.c.bf16 %v91_v7, %v89_v6  ;;  %v93_v12 = vld [vmem:[#allocation6 + $0x48] sm:$0xff]  ;;  %543 = vmatprep.subr.bf16.mxu0 %v542_v4  ;;  %v95_v13 = vld [vmem:[#allocation6 + $0x58] sm:$0xff]  ;;  %v548_v14 = vpack.c.bf16 %v90_v11, %v88_v10  ;;  %v92_v16 = vld [vmem:[#allocation6 + $0x40] sm:$0xff]  ;;  %v118_v6 = vlaneseq }
  0x4e   :  { %545 = vmatpush1.bf16.msra.mxu0 %v544_v8  ;;  %v550_v15 = vpack.c.bf16 %v95_v13, %v93_v12  ;;  %v94_v17 = vld [vmem:[#allocation6 + $0x50] sm:$0xff]  ;;  %v97_v18 = vld [vmem:[#allocation6 + $0x68] sm:$0xff]  ;;  %v99_v19 = vld [vmem:[#allocation6 + $0x78] sm:$0xff] }
  0x4f   :  { %547 = vmatprep.subr.bf16.mxu0 %v546_v9  ;;  %v552_v20 = vpack.c.bf16 %v94_v17, %v92_v16  ;;  %v554_v21 = vpack.c.bf16 %v99_v19, %v97_v18  ;;  %v96_v22 = vld [vmem:[#allocation6 + $0x60] sm:$0xff]  ;;  %v98_v23 = vld [vmem:[#allocation6 + $0x70] sm:$0xff]  ;;  %v101_v24 = vld [vmem:[#allocation6 + $0x88] sm:$0xff]  ;;  %v119_v7 = vshrl.u32 %v118_v6, 7 }
  0x50   :  { %v103_v25 = vld [vmem:[#allocation6 + $0x98] sm:$0xff]  ;;  %v209_v26 = vld [vmem:[#allocation8] sm:$0xff]  ;;  %v210_v27 = vld [vmem:[#allocation8 + $0x8] sm:$0xff]  ;;  %v556_v28 = vpack.c.bf16 %v98_v23, %v96_v22 }
  0x51   :  { %v100_v29 = vld [vmem:[#allocation6 + $0x80] sm:$0xff]  ;;  %v574_v30 = vpack.c.bf16 %v210_v27, %v209_v26  ;;  %v211_v31 = vld [vmem:[#allocation8 + $0x10] sm:$0xff]  ;;  %v212_v32 = vld [vmem:[#allocation8 + $0x18] sm:$0xff]  ;;  %v558_v33 = vpack.c.bf16 %v103_v25, %v101_v24  ;;  %v124_v9 = vsub.s32 1, %v119_v7 }
  0x52   :  { %549 = vmatpush1.bf16.msra.mxu0 %v548_v14  ;;  %v102_v34 = vld [vmem:[#allocation6 + $0x90] sm:$0xff]  ;;  %v578_v35 = vpack.c.bf16 %v212_v32, %v211_v31  ;;  %v213_v36 = vld [vmem:[#allocation8 + $0x20] sm:$0xff]  ;;  %v214_v37 = vld [vmem:[#allocation8 + $0x28] sm:$0xff] }
  0x53   :  { %551 = vmatprep.subr.bf16.mxu0 %v550_v15  ;;  %v105_v38 = vld [vmem:[#allocation6 + $0xa8] sm:$0xff]  ;;  %v107_v39 = vld [vmem:[#allocation6 + $0xb8] sm:$0xff]  ;;  %575 = vmatprep.subr.bf16.mxu1 %v574_v30  ;;  %v560_v40 = vpack.c.bf16 %v102_v34, %v100_v29  ;;  %v104_v41 = vld [vmem:[#allocation6 + $0xa0] sm:$0xff]  ;;  %v582_v42 = vpack.c.bf16 %v214_v37, %v213_v36  ;;  %v120_v37 = vsub.s32 0, %v119_v7 }
  0x54   :  { %577 = vmatpush3.bf16.msra.mxu1 %v574_v30  ;;  %v562_v43 = vpack.c.bf16 %v107_v39, %v105_v38  ;;  %v106_v44 = vld [vmem:[#allocation6 + $0xb0] sm:$0xff]  ;;  %v216_v46 = vld [vmem:[#allocation8 + $0x38] sm:$0xff]  ;;  %v109_v47 = vld [vmem:[#allocation6 + $0xc8] sm:$0xff] }
  0x55   :  { %579 = vmatprep.subr.bf16.mxu1 %v578_v35  ;;  %v215_v45 = vld [vmem:[#allocation8 + $0x30] sm:$0xff]  ;;  %v111_v48 = vld [vmem:[#allocation6 + $0xd8] sm:$0xff]  ;;  %v564_v49 = vpack.c.bf16 %v106_v44, %v104_v41  ;;  %v108_v50 = vld [vmem:[#allocation6 + $0xc0] sm:$0xff] }
  0x56   :  { %553 = vmatpush1.bf16.msra.mxu0 %v552_v20  ;;  %v586_v51 = vpack.c.bf16 %v216_v46, %v215_v45  ;;  %v566_v52 = vpack.c.bf16 %v111_v48, %v109_v47  ;;  %v110_v53 = vld [vmem:[#allocation6 + $0xd0] sm:$0xff]  ;;  %v217_v54 = vld [vmem:[#allocation8 + $0x40] sm:$0xff]  ;;  %v218_v55 = vld [vmem:[#allocation8 + $0x48] sm:$0xff] }
  0x57   :  { %555 = vmatprep.subr.bf16.mxu0 %v554_v21  ;;  %v113_v56 = vld [vmem:[#allocation6 + $0xe8] sm:$0xff]  ;;  %v115_v57 = vld [vmem:[#allocation6 + $0xf8] sm:$0xff]  ;;  %v568_v58 = vpack.c.bf16 %v110_v53, %v108_v50  ;;  %v112_v59 = vld [vmem:[#allocation6 + $0xe0] sm:$0xff]  ;;  %v590_v60 = vpack.c.bf16 %v218_v55, %v217_v54 }
  0x58   :  { %581 = vmatpush3.bf16.msra.mxu1 %v578_v35  ;;  %v570_v61 = vpack.c.bf16 %v115_v57, %v113_v56  ;;  %v114_v62 = vld [vmem:[#allocation6 + $0xf0] sm:$0xff]  ;;  %v220_v1 = vld [vmem:[#allocation8 + $0x58] sm:$0xff]  ;;  %v221_v10 = vld [vmem:[#allocation8 + $0x60] sm:$0xff] }
  0x59   :  { %583 = vmatprep.subr.bf16.mxu1 %v582_v42  ;;  %v219_v63 = vld [vmem:[#allocation8 + $0x50] sm:$0xff]  ;;  %v572_v2 = vpack.c.bf16 %v114_v62, %v112_v59  ;;  %v83_v5 = vld [vmem:[#allocation3 + $0x8] sm:$0xff]  ;;  %v222_v11 = vld [vmem:[#allocation8 + $0x68] sm:$0xff] }
  0x5a   :  { %557 = vmatpush1.bf16.msra.mxu0 %v556_v28  ;;  %v594_v3 = vpack.c.bf16 %v220_v1, %v219_v63  ;;  %v82_v4 = vld [vmem:[#allocation3] sm:$0xff]  ;;  %v598_v12 = vpack.c.bf16 %v222_v11, %v221_v10  ;;  %v224_v15 = vld [vmem:[#allocation8 + $0x78] sm:$0xff]  ;;  %v310_v17 = vld [vmem:[#allocation9 + $0x8] sm:$0xff] }
  0x5b   :  { %559 = vmatprep.subr.bf16.mxu0 %v558_v33  ;;  %v116_v8 = vld [vmem:[%s908_s2] sm:$0x3]  ;;  %v312_v20 = vld [vmem:[#allocation9 + $0x18] sm:$0xff]  ;;  %v313_v22 = vld [vmem:[#allocation9 + $0x20] sm:$0xff] }
  0x5c   :  { %585 = vmatpush3.bf16.msra.mxu1 %v582_v42  ;;  %v125_v13 = vrot.slane %v116_v8, %v124_v9  ;;  %v223_v14 = vld [vmem:[#allocation8 + $0x70] sm:$0xff]  ;;  %v314_v23 = vld [vmem:[#allocation9 + $0x28] sm:$0xff]  ;;  %v316_v26 = vld [vmem:[#allocation9 + $0x38] sm:$0xff]  ;;  %v121_v38 = vrot.slane %v116_v8, %v120_v37 }
  0x5d   :  { %587 = vmatprep.subr.bf16.mxu1 %v586_v51  ;;  %v602_v16 = vpack.c.bf16 %v224_v15, %v223_v14  ;;  %v311_v18 = vld [vmem:[#allocation9 + $0x10] sm:$0xff]  ;;  %v614_v24 = vpack.c.bf16 %v314_v23, %v313_v22  ;;  %v317_v28 = vld [vmem:[#allocation9 + $0x40] sm:$0xff]  ;;  %v318_v29 = vld [vmem:[#allocation9 + $0x48] sm:$0xff] }
  0x5e   :  { %561 = vmatpush1.bf16.msra.mxu0 %v560_v40  ;;  %v610_v21 = vpack.c.bf16 %v312_v20, %v311_v18  ;;  %v315_v25 = vld [vmem:[#allocation9 + $0x30] sm:$0xff]  ;;  %v622_v30 = vpack.c.bf16 %v318_v29, %v317_v28  ;;  %v320_v32 = vld [vmem:[#allocation9 + $0x58] sm:$0xff]  ;;  %v321_v34 = vld [vmem:[#allocation9 + $0x60] sm:$0xff] }
  0x5f   :  { %563 = vmatprep.subr.bf16.mxu0 %v562_v43  ;;  %v618_v27 = vpack.c.bf16 %v316_v26, %v315_v25  ;;  %v319_v31 = vld [vmem:[#allocation9 + $0x50] sm:$0xff]  ;;  %v322_v35 = vld [vmem:[#allocation9 + $0x68] sm:$0xff]  ;;  %v324_v50 = vld [vmem:[#allocation9 + $0x78] sm:$0xff] }
  0x60   :  { %589 = vmatpush3.bf16.msra.mxu1 %v586_v51  ;;  %v626_v33 = vpack.c.bf16 %v320_v32, %v319_v31  ;;  %v630_v36 = vpack.c.bf16 %v322_v35, %v321_v34  ;;  %v435_v59 = vld [vmem:[%s912_s6] ss:$0 sm:$0xff] }
  0x61   :  { %591 = vmatprep.subr.bf16.mxu1 %v590_v60 }
  0x62   :  { %565 = vmatpush1.bf16.msra.mxu0 %v564_v49  ;;  %v323_v49 = vld [vmem:[#allocation9 + $0x70] sm:$0xff] }
  0x63   :  { %567 = vmatprep.subr.bf16.mxu0 %v566_v52  ;;  %v634_v51 = vpack.c.bf16 %v324_v50, %v323_v49  ;;  %v434_v52 = vld [vmem:[%s910_s4] ss:$0 sm:$0xff]  ;;  %s736_s4 = scalar_lea.vmem %s421_s10, 256 }
  0x64   :  { %593 = vmatpush3.bf16.msra.mxu1 %v590_v60  ;;  %p737_p4 = scmp.ne.s32.totalorder %s421_s10, %s736_s4  ;;  %p742_p6 = scmp.lt.s32.totalorder %s736_s4, %s736_s4 }
  0x65   :  { %595 = vmatprep.subr.bf16.mxu1 %v594_v3 }
  0x66   :  { %569 = vmatpush1.bf16.msra.mxu0 %v568_v58  ;;  %p743_p7 = por %p742_p6, %p741_p5 }
  0x67   :  { %571 = vmatprep.subr.bf16.mxu0 %v570_v61 }
  0x68   :  { %597 = vmatpush3.bf16.msra.mxu1 %v594_v3  ;;  %p744_p8 = pnand %p743_p7, %p737_p4 }
  0x69   :  { %599 = vmatprep.subr.bf16.mxu1 %v598_v12 }
  0x6a   :  { %573 = vmatpush1.bf16.msra.mxu0 %v572_v2 }
  0x6c   :  { %601 = vmatpush3.bf16.msra.mxu1 %v598_v12 }
  0x6d   :  { %193 = vmatmul.mubr.f32.vlgmr.msra.gmra.mrb[0].mxu0 %v82_v4  ;;  %603 = vmatprep.subr.bf16.mxu1 %v602_v16 }
  0x6e   :  { %198 = vmatprep.mubr.f32.mxu0 %v774_v0  ;;  %v309_v0 = vld [vmem:[#allocation9] sm:$0xff] }
  0x6f   :  { %v606_v19 = vpack.c.bf16 %v310_v17, %v309_v0 }
  0x70   :  { %605 = vmatpush3.bf16.msra.mxu1 %v602_v16 }
  0x71   :  { %199 = vmatmul.mubr.f32.gmra.mrb[2].mxu0 %v83_v5  ;;  %607 = vmatprep.subr.bf16.mxu0 %v606_v19 }
  0x72   :  { %609 = vmatpush3.bf16.msra.mxu0 %v606_v19 }
  0x73   :  { %611 = vmatprep.subr.bf16.mxu0 %v610_v21 }
  0x76   :  { %613 = vmatpush3.bf16.msra.mxu0 %v610_v21 }
  0x77   :  { %615 = vmatprep.subr.bf16.mxu0 %v614_v24 }
  0x7a   :  { %617 = vmatpush3.bf16.msra.mxu0 %v614_v24 }
  0x7b   :  { %619 = vmatprep.subr.bf16.mxu0 %v618_v27 }
  0x7e   :  { %621 = vmatpush3.bf16.msra.mxu0 %v618_v27 }
  0x7f   :  { %623 = vmatprep.subr.bf16.mxu0 %v622_v30 }
  0x82   :  { %625 = vmatpush3.bf16.msra.mxu0 %v622_v30 }
  0x83   :  { %627 = vmatprep.subr.bf16.mxu0 %v626_v33 }
  0x86   :  { %629 = vmatpush3.bf16.msra.mxu0 %v626_v33 }
  0x87   :  { %631 = vmatprep.subr.bf16.mxu0 %v630_v36 }
  0x8a   :  { %633 = vmatpush3.bf16.msra.mxu0 %v630_v36 }
  0x8b   :  { %635 = vmatprep.subr.bf16.mxu0 %v634_v51 }
  0x8e   :  { %637 = vmatpush3.bf16.msra.mxu0 %v634_v51 }
 0x140   :  { %v194_v39 = vpop.f32.mrb[0].mxu0 }
 0x141   :  { %v196_v40 = vpop.f32.mrb[1].mxu0  ;;  %v195_v41 = vadd.f32 %v194_v39, %v121_v38 }
 0x142   :  { %v197_v42 = vadd.f32 %v196_v40, %v125_v13 }
 0x143   :  { %v207_v43 = vmax.f32 %v195_v41, 0.0 }
 0x144   :  { %v200_v44 = vpop.f32.mrb[2].mxu0 }
 0x145   :  { %v201_v45 = vadd.f32 %v200_v44, %v121_v38  ;;  %v202_v46 = vpop.f32.mrb[3].mxu0  ;;  %504 = vmatprep.mubr.f32.mxu1 %v207_v43 }
 0x146   :  { %v203_v47 = vadd.f32 %v202_v46, %v125_v13 }
 0x147   :  { %v208_v48 = vmax.f32 %v201_v45, 0.0 }
 0x149   :  { %505 = vmatmul.mubr.f32.vlgmr.msra.gmra.mrb[0].mxu1 %v208_v48 }
 0x21c   :  { %v506_v53 = vpop.f32.mrb[0].mxu1 }
 0x21d   :  { %v304_v54 = vadd.f32 %v506_v53, %v434_v52  ;;  %v298_v55 = vpop.f32.mrb[1].mxu1 }
 0x21e   :  { %v299_v56 = vadd.f32 %v434_v52, %v298_v55 }
 0x21f   :  { %v308_v58 = vmax.f32 %v304_v54, 0.0 }
 0x220   :  { %v307_v57 = vmax.f32 %v299_v56, 0.0 }
 0x222   :  { %539 = vmatprep.mubr.f32.mxu0 %v307_v57 }
 0x223   :  { %540 = vmatmul.mubr.f32.vlgmr.msra.gmra.mrb[4].mxu0 %v308_v58 }
 0x2f6   :  { %v541_v60 = vpop.f32.mrb[4].mxu0 }
 0x2f7   :  { %v404_v61 = vadd.f32 %v541_v60, %v435_v59  ;;  %v398_v62 = vpop.f32.mrb[5].mxu0 }
 0x2f8   :  { %v399_v63 = vadd.f32 %v435_v59, %v398_v62 }
 0x2f9   :  { %v408_v1 = vmax.f32 %v404_v61, 0.0 }
 0x2fa   :  { %v407_v2 = vmax.f32 %v399_v63, 0.0 }
 0x2fb   :  { %v412_v3 = vadd.f32 %v408_v1, %v203_v47 }
 0x2fc   :  { %v411_v4 = vadd.f32 %v407_v2, %v197_v42 }
 0x2fd   :  { %414 = vst [vmem:[#allocation11 + $0x8] sm:$0xff] %v412_v3 }
 0x2fe   :  { %413 = vst [vmem:[#allocation11] sm:$0xff] %v411_v4 }
 0x2ff   :  { %747 = shalt.err (!%p744_p8)
}
 0x300   :  { %s748_s12 = scalar_lea.hbm %s913_s7, 256 }
 0x301   :  { %p749_p9 = scmp.ne.s32.totalorder %s913_s7, %s748_s12  ;;  %p752_p10 = scmp.lt.u32.totalorder %s748_s12, %s913_s7 }
 0x303   :  { %p754_p11 = pnand %p752_p10, %p749_p9 }
 0x305   :  { %757 = shalt.err (!%p754_p11)
}
 0x306   :  { %426 = dma.vmem_to_hbm [thread:$0]  %s421_s10, 256, %s913_s7, [#allocation5], %s770_s1, %s770_s1, %s771_s25  }
 0x307   :  { %764 = dma.done.wait [#allocation5], 256  }
 0x308   :  { %765 = vsyncadd [#allocation5], 4294967040 }
 0x309   :  { %430 = vsyncpa [#allocation4], 1 }
 0x30a   :  { %431 = vsyncpa [#allocation7], 1 }
 0x30b   :  { %432 = vsyncpa [#allocation10], 1 }
 0x30c   :  { %433 = vsyncpa [#allocation5], 1 }

// kernel: tpu_custom_call.1
= control target key start
LH: loop header
LB: loop body
LE: loop exit
PB: predicated region body
PF: predicated region fallthrough
CT: control target
= control target key end

     0   :  { %12 = vsyncpa [#allocation4], 0  ;;  %s906_s0 = inlined_call_operand.hbm [shape: f32[16,128], index: 0, kind: input, shape index: {}]   ;;  %s907_s1 = inlined_call_operand.hbm [shape: f32[128,256], index: 1, kind: input, shape index: {}]   ;;  %s908_s2 = inlined_call_operand.vmem [shape: f32[1,256], index: 2, kind: input, shape index: {}]   ;;  %s909_s3 = inlined_call_operand.hbm [shape: f32[128,128], index: 3, kind: input, shape index: {}]   ;;  %s910_s4 = inlined_call_operand.vmem [shape: f32[1,128], index: 4, kind: input, shape index: {}]   ;;  %s911_s5 = inlined_call_operand.hbm [shape: f32[128,128], index: 5, kind: input, shape index: {}]   ;;  %s912_s6 = inlined_call_operand.vmem [shape: f32[1,128], index: 6, kind: input, shape index: {}]   ;;  %s913_s7 = inlined_call_operand.hbm [shape: f32[16,128], index: 7, kind: output, shape index: {}]  }
   0x1   :  { %13 = vsyncpa [#allocation7], 0 }
   0x2   :  { %14 = vsyncpa [#allocation10], 0 }
   0x3   :  { %15 = vsyncpa [#allocation5], 0  ;;  %s766_s24 = smov [#allocation6]   ;;  %s648_s28 = scalar_lea.hbm %s907_s1, 4096 }
   0x4   :  { %s33_s25 = sshll.u32 %s766_s24, 4  ;;  %p649_p0 = scmp.ne.s32.totalorder %s907_s1, %s648_s28  ;;  %s34_s25 = int_to_ptr.vmem [resolvable:$true] %s33_s25 }
   0x5   :  { %p652_p1 = scmp.lt.u32.totalorder %s648_s28, %s907_s1 }
   0x7   :  { %p654_p2 = pnand %p652_p1, %p649_p0 }
   0x9   :  { %657 = shalt.err (!%p654_p2)
}
   0xa   :  { %s658_s10 = scalar_lea.vmem %s34_s25, 4096  ;;  %p663_p4 = scmp.lt.s32.totalorder %s34_s25, %s34_s25 }
   0xb   :  { %p659_p3 = scmp.ne.s32.totalorder %s34_s25, %s658_s10  ;;  %p664_p5 = scmp.lt.s32.totalorder %s658_s10, %s658_s10 }
   0xd   :  { %p665_p6 = por %p664_p5, %p663_p4 }
   0xf   :  { %p666_p7 = pnand %p665_p6, %p659_p3 }
  0x11   :  { %669 = shalt.err (!%p666_p7)
}
  0x12   :  { %s767_s11 = smov 256   ;;  %s768_s12 = smov 16  }
  0x13   :  { %39 = dma.hbm_to_vmem [thread:$0]  %s907_s1, 4096, %s34_s25, [#allocation7], %s767_s11, %s767_s11, %s768_s12  }
  0x14   :  { %s769_s15 = smov [#allocation3]   ;;  %s670_s19 = scalar_lea.hbm %s906_s0, 256 }
  0x15   :  { %s21_s16 = sshll.u32 %s769_s15, 4  ;;  %p671_p8 = scmp.ne.s32.totalorder %s906_s0, %s670_s19  ;;  %s22_s16 = int_to_ptr.vmem [resolvable:$true] %s21_s16 }
  0x16   :  { %p674_p9 = scmp.lt.u32.totalorder %s670_s19, %s906_s0 }
  0x18   :  { %p676_p10 = pnand %p674_p9, %p671_p8 }
  0x1a   :  { %679 = shalt.err (!%p676_p10)
}
  0x1b   :  { %s680_s24 = scalar_lea.vmem %s22_s16, 256  ;;  %p685_p12 = scmp.lt.s32.totalorder %s22_s16, %s22_s16 }
  0x1c   :  { %p681_p11 = scmp.ne.s32.totalorder %s22_s16, %s680_s24  ;;  %p686_p13 = scmp.lt.s32.totalorder %s680_s24, %s680_s24 }
  0x1e   :  { %p687_p0 = por %p686_p13, %p685_p12 }
  0x20   :  { %p688_p1 = pnand %p687_p0, %p681_p11 }
  0x22   :  { %691 = shalt.err (!%p688_p1)
}
  0x23   :  { %s770_s1 = smov 128   ;;  %s771_s25 = smov 8  }
  0x24   :  { %27 = dma.hbm_to_vmem [thread:$0]  %s906_s0, 256, %s22_s16, [#allocation4], %s770_s1, %s770_s1, %s771_s25  }
  0x25   :  { %s772_s28 = smov [#allocation8]   ;;  %s773_s30 = smov [#allocation9]  }
  0x26   :  { %s47_s29 = sshll.u32 %s772_s28, 4  ;;  %s61_s8 = sshll.u32 %s773_s30, 4  ;;  %s48_s29 = int_to_ptr.vmem [resolvable:$true] %s47_s29  ;;  %s843_s8 = int_to_ptr.vmem [resolvable:$true] %s61_s8 }
  0x27   :  { %s692_s11 = scalar_lea.hbm %s909_s3, 2048 }
  0x28   :  { %p693_p2 = scmp.ne.s32.totalorder %s909_s3, %s692_s11  ;;  %p696_p3 = scmp.lt.u32.totalorder %s692_s11, %s909_s3 }
  0x2a   :  { %p698_p4 = pnand %p696_p3, %p693_p2 }
  0x2c   :  { %701 = shalt.err (!%p698_p4)
}
  0x2d   :  { %s702_s0 = scalar_lea.vmem %s48_s29, 2048  ;;  %p707_p6 = scmp.lt.s32.totalorder %s48_s29, %s48_s29 }
  0x2e   :  { %p703_p5 = scmp.ne.s32.totalorder %s48_s29, %s702_s0  ;;  %p708_p7 = scmp.lt.s32.totalorder %s702_s0, %s702_s0 }
  0x30   :  { %p709_p8 = por %p708_p7, %p707_p6 }
  0x32   :  { %p710_p9 = pnand %p709_p8, %p703_p5 }
  0x34   :  { %713 = shalt.err (!%p710_p9)
}
  0x35   :  { %53 = dma.hbm_to_vmem [thread:$0]  %s909_s3, 2048, %s48_s29, [#allocation7], %s770_s1, %s770_s1, %s771_s25  }
  0x36   :  { %s714_s20 = scalar_lea.hbm %s911_s5, 2048 }
  0x37   :  { %p715_p10 = scmp.ne.s32.totalorder %s911_s5, %s714_s20  ;;  %p718_p11 = scmp.lt.u32.totalorder %s714_s20, %s911_s5 }
  0x39   :  { %p720_p12 = pnand %p718_p11, %p715_p10 }
  0x3b   :  { %723 = shalt.err (!%p720_p12)
}
  0x3c   :  { %s724_s26 = scalar_lea.vmem %s843_s8, 2048  ;;  %p729_p0 = scmp.lt.s32.totalorder %s843_s8, %s843_s8 }
  0x3d   :  { %p725_p13 = scmp.ne.s32.totalorder %s843_s8, %s724_s26  ;;  %p730_p1 = scmp.lt.s32.totalorder %s724_s26, %s724_s26 }
  0x3f   :  { %p731_p2 = por %p730_p1, %p729_p0 }
  0x41   :  { %p732_p3 = pnand %p731_p2, %p725_p13 }
  0x43   :  { %735 = shalt.err (!%p732_p3)
}
  0x44   :  { %67 = dma.hbm_to_vmem [thread:$0]  %s911_s5, 2048, %s843_s8, [#allocation10], %s770_s1, %s770_s1, %s771_s25  }
  0x45   :  { %758 = dma.done.wait [#allocation4], 256  }
  0x46   :  { %759 = vsyncadd [#allocation4], 4294967040 }
  0x47   :  { %760 = dma.done.wait [#allocation7], 6144  }
  0x48   :  { %761 = vsyncadd [#allocation7], 4294961152 }
  0x49   :  { %762 = dma.done.wait [#allocation10], 2048  }
  0x4a   :  { %763 = vsyncadd [#allocation10], 4294965248  ;;  %v774_v0 = vmov 0.0   ;;  %v85_v1 = vld [vmem:[#allocation6 + $0x8] sm:$0xff]  ;;  %v87_v2 = vld [vmem:[#allocation6 + $0x18] sm:$0xff]  ;;  %s775_s9 = smov [#allocation11]  }
  0x4b   :  { %192 = vmatprep.mubr.f32.mxu0 %v774_v0  ;;  %v84_v3 = vld [vmem:[#allocation6] sm:$0xff]  ;;  %v542_v4 = vpack.c.bf16 %v87_v2, %v85_v1  ;;  %v86_v5 = vld [vmem:[#allocation6 + $0x10] sm:$0xff]  ;;  %v89_v6 = vld [vmem:[#allocation6 + $0x28] sm:$0xff]  ;;  %s420_s10 = sshll.u32 %s775_s9, 4  ;;  %s421_s10 = int_to_ptr.vmem [resolvable:$true] %s420_s10 }
  0x4c   :  { %v91_v7 = vld [vmem:[#allocation6 + $0x38] sm:$0xff]  ;;  %v544_v8 = vpack.c.bf16 %v86_v5, %v84_v3  ;;  %v88_v10 = vld [vmem:[#allocation6 + $0x20] sm:$0xff]  ;;  %v90_v11 = vld [vmem:[#allocation6 + $0x30] sm:$0xff]  ;;  %p741_p5 = scmp.lt.s32.totalorder %s421_s10, %s421_s10 }
  0x4d   :  { %v546_v9 = vpack.c.bf16 %v91_v7, %v89_v6  ;;  %v93_v12 = vld [vmem:[#allocation6 + $0x48] sm:$0xff]  ;;  %543 = vmatprep.subr.bf16.mxu0 %v542_v4  ;;  %v95_v13 = vld [vmem:[#allocation6 + $0x58] sm:$0xff]  ;;  %v548_v14 = vpack.c.bf16 %v90_v11, %v88_v10  ;;  %v92_v16 = vld [vmem:[#allocation6 + $0x40] sm:$0xff]  ;;  %v118_v6 = vlaneseq }
  0x4e   :  { %545 = vmatpush1.bf16.msra.mxu0 %v544_v8  ;;  %v550_v15 = vpack.c.bf16 %v95_v13, %v93_v12  ;;  %v94_v17 = vld [vmem:[#allocation6 + $0x50] sm:$0xff]  ;;  %v97_v18 = vld [vmem:[#allocation6 + $0x68] sm:$0xff]  ;;  %v99_v19 = vld [vmem:[#allocation6 + $0x78] sm:$0xff] }
  0x4f   :  { %547 = vmatprep.subr.bf16.mxu0 %v546_v9  ;;  %v552_v20 = vpack.c.bf16 %v94_v17, %v92_v16  ;;  %v554_v21 = vpack.c.bf16 %v99_v19, %v97_v18  ;;  %v96_v22 = vld [vmem:[#allocation6 + $0x60] sm:$0xff]  ;;  %v98_v23 = vld [vmem:[#allocation6 + $0x70] sm:$0xff]  ;;  %v101_v24 = vld [vmem:[#allocation6 + $0x88] sm:$0xff]  ;;  %v119_v7 = vshrl.u32 %v118_v6, 7 }
  0x50   :  { %v103_v25 = vld [vmem:[#allocation6 + $0x98] sm:$0xff]  ;;  %v209_v26 = vld [vmem:[#allocation8] sm:$0xff]  ;;  %v210_v27 = vld [vmem:[#allocation8 + $0x8] sm:$0xff]  ;;  %v556_v28 = vpack.c.bf16 %v98_v23, %v96_v22 }
  0x51   :  { %v100_v29 = vld [vmem:[#allocation6 + $0x80] sm:$0xff]  ;;  %v574_v30 = vpack.c.bf16 %v210_v27, %v209_v26  ;;  %v211_v31 = vld [vmem:[#allocation8 + $0x10] sm:$0xff]  ;;  %v212_v32 = vld [vmem:[#allocation8 + $0x18] sm:$0xff]  ;;  %v558_v33 = vpack.c.bf16 %v103_v25, %v101_v24  ;;  %v124_v9 = vsub.s32 1, %v119_v7 }
  0x52   :  { %549 = vmatpush1.bf16.msra.mxu0 %v548_v14  ;;  %v102_v34 = vld [vmem:[#allocation6 + $0x90] sm:$0xff]  ;;  %v578_v35 = vpack.c.bf16 %v212_v32, %v211_v31  ;;  %v213_v36 = vld [vmem:[#allocation8 + $0x20] sm:$0xff]  ;;  %v214_v37 = vld [vmem:[#allocation8 + $0x28] sm:$0xff] }
  0x53   :  { %551 = vmatprep.subr.bf16.mxu0 %v550_v15  ;;  %v105_v38 = vld [vmem:[#allocation6 + $0xa8] sm:$0xff]  ;;  %v107_v39 = vld [vmem:[#allocation6 + $0xb8] sm:$0xff]  ;;  %575 = vmatprep.subr.bf16.mxu1 %v574_v30  ;;  %v560_v40 = vpack.c.bf16 %v102_v34, %v100_v29  ;;  %v104_v41 = vld [vmem:[#allocation6 + $0xa0] sm:$0xff]  ;;  %v582_v42 = vpack.c.bf16 %v214_v37, %v213_v36  ;;  %v120_v37 = vsub.s32 0, %v119_v7 }
  0x54   :  { %577 = vmatpush3.bf16.msra.mxu1 %v574_v30  ;;  %v562_v43 = vpack.c.bf16 %v107_v39, %v105_v38  ;;  %v106_v44 = vld [vmem:[#allocation6 + $0xb0] sm:$0xff]  ;;  %v216_v46 = vld [vmem:[#allocation8 + $0x38] sm:$0xff]  ;;  %v109_v47 = vld [vmem:[#allocation6 + $0xc8] sm:$0xff] }
  0x55   :  { %579 = vmatprep.subr.bf16.mxu1 %v578_v35  ;;  %v215_v45 = vld [vmem:[#allocation8 + $0x30] sm:$0xff]  ;;  %v111_v48 = vld [vmem:[#allocation6 + $0xd8] sm:$0xff]  ;;  %v564_v49 = vpack.c.bf16 %v106_v44, %v104_v41  ;;  %v108_v50 = vld [vmem:[#allocation6 + $0xc0] sm:$0xff] }
  0x56   :  { %553 = vmatpush1.bf16.msra.mxu0 %v552_v20  ;;  %v586_v51 = vpack.c.bf16 %v216_v46, %v215_v45  ;;  %v566_v52 = vpack.c.bf16 %v111_v48, %v109_v47  ;;  %v110_v53 = vld [vmem:[#allocation6 + $0xd0] sm:$0xff]  ;;  %v217_v54 = vld [vmem:[#allocation8 + $0x40] sm:$0xff]  ;;  %v218_v55 = vld [vmem:[#allocation8 + $0x48] sm:$0xff] }
  0x57   :  { %555 = vmatprep.subr.bf16.mxu0 %v554_v21  ;;  %v113_v56 = vld [vmem:[#allocation6 + $0xe8] sm:$0xff]  ;;  %v115_v57 = vld [vmem:[#allocation6 + $0xf8] sm:$0xff]  ;;  %v568_v58 = vpack.c.bf16 %v110_v53, %v108_v50  ;;  %v112_v59 = vld [vmem:[#allocation6 + $0xe0] sm:$0xff]  ;;  %v590_v60 = vpack.c.bf16 %v218_v55, %v217_v54 }
  0x58   :  { %581 = vmatpush3.bf16.msra.mxu1 %v578_v35  ;;  %v570_v61 = vpack.c.bf16 %v115_v57, %v113_v56  ;;  %v114_v62 = vld [vmem:[#allocation6 + $0xf0] sm:$0xff]  ;;  %v220_v1 = vld [vmem:[#allocation8 + $0x58] sm:$0xff]  ;;  %v221_v10 = vld [vmem:[#allocation8 + $0x60] sm:$0xff] }
  0x59   :  { %583 = vmatprep.subr.bf16.mxu1 %v582_v42  ;;  %v219_v63 = vld [vmem:[#allocation8 + $0x50] sm:$0xff]  ;;  %v572_v2 = vpack.c.bf16 %v114_v62, %v112_v59  ;;  %v83_v5 = vld [vmem:[#allocation3 + $0x8] sm:$0xff]  ;;  %v222_v11 = vld [vmem:[#allocation8 + $0x68] sm:$0xff] }
  0x5a   :  { %557 = vmatpush1.bf16.msra.mxu0 %v556_v28  ;;  %v594_v3 = vpack.c.bf16 %v220_v1, %v219_v63  ;;  %v82_v4 = vld [vmem:[#allocation3] sm:$0xff]  ;;  %v598_v12 = vpack.c.bf16 %v222_v11, %v221_v10  ;;  %v224_v15 = vld [vmem:[#allocation8 + $0x78] sm:$0xff]  ;;  %v310_v17 = vld [vmem:[#allocation9 + $0x8] sm:$0xff] }
  0x5b   :  { %559 = vmatprep.subr.bf16.mxu0 %v558_v33  ;;  %v116_v8 = vld [vmem:[%s908_s2] sm:$0x3]  ;;  %v312_v20 = vld [vmem:[#allocation9 + $0x18] sm:$0xff]  ;;  %v313_v22 = vld [vmem:[#allocation9 + $0x20] sm:$0xff] }
  0x5c   :  { %585 = vmatpush3.bf16.msra.mxu1 %v582_v42  ;;  %v125_v13 = vrot.slane %v116_v8, %v124_v9  ;;  %v223_v14 = vld [vmem:[#allocation8 + $0x70] sm:$0xff]  ;;  %v314_v23 = vld [vmem:[#allocation9 + $0x28] sm:$0xff]  ;;  %v316_v26 = vld [vmem:[#allocation9 + $0x38] sm:$0xff]  ;;  %v121_v38 = vrot.slane %v116_v8, %v120_v37 }
  0x5d   :  { %587 = vmatprep.subr.bf16.mxu1 %v586_v51  ;;  %v602_v16 = vpack.c.bf16 %v224_v15, %v223_v14  ;;  %v311_v18 = vld [vmem:[#allocation9 + $0x10] sm:$0xff]  ;;  %v614_v24 = vpack.c.bf16 %v314_v23, %v313_v22  ;;  %v317_v28 = vld [vmem:[#allocation9 + $0x40] sm:$0xff]  ;;  %v318_v29 = vld [vmem:[#allocation9 + $0x48] sm:$0xff] }
  0x5e   :  { %561 = vmatpush1.bf16.msra.mxu0 %v560_v40  ;;  %v610_v21 = vpack.c.bf16 %v312_v20, %v311_v18  ;;  %v315_v25 = vld [vmem:[#allocation9 + $0x30] sm:$0xff]  ;;  %v622_v30 = vpack.c.bf16 %v318_v29, %v317_v28  ;;  %v320_v32 = vld [vmem:[#allocation9 + $0x58] sm:$0xff]  ;;  %v321_v34 = vld [vmem:[#allocation9 + $0x60] sm:$0xff] }
  0x5f   :  { %563 = vmatprep.subr.bf16.mxu0 %v562_v43  ;;  %v618_v27 = vpack.c.bf16 %v316_v26, %v315_v25  ;;  %v319_v31 = vld [vmem:[#allocation9 + $0x50] sm:$0xff]  ;;  %v322_v35 = vld [vmem:[#allocation9 + $0x68] sm:$0xff]  ;;  %v324_v50 = vld [vmem:[#allocation9 + $0x78] sm:$0xff] }
  0x60   :  { %589 = vmatpush3.bf16.msra.mxu1 %v586_v51  ;;  %v626_v33 = vpack.c.bf16 %v320_v32, %v319_v31  ;;  %v630_v36 = vpack.c.bf16 %v322_v35, %v321_v34  ;;  %v435_v59 = vld [vmem:[%s912_s6] ss:$0 sm:$0xff] }
  0x61   :  { %591 = vmatprep.subr.bf16.mxu1 %v590_v60 }
  0x62   :  { %565 = vmatpush1.bf16.msra.mxu0 %v564_v49  ;;  %v323_v49 = vld [vmem:[#allocation9 + $0x70] sm:$0xff] }
  0x63   :  { %567 = vmatprep.subr.bf16.mxu0 %v566_v52  ;;  %v634_v51 = vpack.c.bf16 %v324_v50, %v323_v49  ;;  %v434_v52 = vld [vmem:[%s910_s4] ss:$0 sm:$0xff]  ;;  %s736_s4 = scalar_lea.vmem %s421_s10, 256 }
  0x64   :  { %593 = vmatpush3.bf16.msra.mxu1 %v590_v60  ;;  %p737_p4 = scmp.ne.s32.totalorder %s421_s10, %s736_s4  ;;  %p742_p6 = scmp.lt.s32.totalorder %s736_s4, %s736_s4 }
  0x65   :  { %595 = vmatprep.subr.bf16.mxu1 %v594_v3 }
  0x66   :  { %569 = vmatpush1.bf16.msra.mxu0 %v568_v58  ;;  %p743_p7 = por %p742_p6, %p741_p5 }
  0x67   :  { %571 = vmatprep.subr.bf16.mxu0 %v570_v61 }
  0x68   :  { %597 = vmatpush3.bf16.msra.mxu1 %v594_v3  ;;  %p744_p8 = pnand %p743_p7, %p737_p4 }
  0x69   :  { %599 = vmatprep.subr.bf16.mxu1 %v598_v12 }
  0x6a   :  { %573 = vmatpush1.bf16.msra.mxu0 %v572_v2 }
  0x6c   :  { %601 = vmatpush3.bf16.msra.mxu1 %v598_v12 }
  0x6d   :  { %193 = vmatmul.mubr.f32.vlgmr.msra.gmra.mrb[0].mxu0 %v82_v4  ;;  %603 = vmatprep.subr.bf16.mxu1 %v602_v16 }
  0x6e   :  { %198 = vmatprep.mubr.f32.mxu0 %v774_v0  ;;  %v309_v0 = vld [vmem:[#allocation9] sm:$0xff] }
  0x6f   :  { %v606_v19 = vpack.c.bf16 %v310_v17, %v309_v0 }
  0x70   :  { %605 = vmatpush3.bf16.msra.mxu1 %v602_v16 }
  0x71   :  { %199 = vmatmul.mubr.f32.gmra.mrb[2].mxu0 %v83_v5  ;;  %607 = vmatprep.subr.bf16.mxu0 %v606_v19 }
  0x72   :  { %609 = vmatpush3.bf16.msra.mxu0 %v606_v19 }
  0x73   :  { %611 = vmatprep.subr.bf16.mxu0 %v610_v21 }
  0x76   :  { %613 = vmatpush3.bf16.msra.mxu0 %v610_v21 }
  0x77   :  { %615 = vmatprep.subr.bf16.mxu0 %v614_v24 }
  0x7a   :  { %617 = vmatpush3.bf16.msra.mxu0 %v614_v24 }
  0x7b   :  { %619 = vmatprep.subr.bf16.mxu0 %v618_v27 }
  0x7e   :  { %621 = vmatpush3.bf16.msra.mxu0 %v618_v27 }
  0x7f   :  { %623 = vmatprep.subr.bf16.mxu0 %v622_v30 }
  0x82   :  { %625 = vmatpush3.bf16.msra.mxu0 %v622_v30 }
  0x83   :  { %627 = vmatprep.subr.bf16.mxu0 %v626_v33 }
  0x86   :  { %629 = vmatpush3.bf16.msra.mxu0 %v626_v33 }
  0x87   :  { %631 = vmatprep.subr.bf16.mxu0 %v630_v36 }
  0x8a   :  { %633 = vmatpush3.bf16.msra.mxu0 %v630_v36 }
  0x8b   :  { %635 = vmatprep.subr.bf16.mxu0 %v634_v51 }
  0x8e   :  { %637 = vmatpush3.bf16.msra.mxu0 %v634_v51 }
 0x140   :  { %v194_v39 = vpop.f32.mrb[0].mxu0 }
 0x141   :  { %v196_v40 = vpop.f32.mrb[1].mxu0  ;;  %v195_v41 = vadd.f32 %v194_v39, %v121_v38 }
 0x142   :  { %v197_v42 = vadd.f32 %v196_v40, %v125_v13 }
 0x143   :  { %v207_v43 = vmax.f32 %v195_v41, 0.0 }
 0x144   :  { %v200_v44 = vpop.f32.mrb[2].mxu0 }
 0x145   :  { %v201_v45 = vadd.f32 %v200_v44, %v121_v38  ;;  %v202_v46 = vpop.f32.mrb[3].mxu0  ;;  %504 = vmatprep.mubr.f32.mxu1 %v207_v43 }
 0x146   :  { %v203_v47 = vadd.f32 %v202_v46, %v125_v13 }
 0x147   :  { %v208_v48 = vmax.f32 %v201_v45, 0.0 }
 0x149   :  { %505 = vmatmul.mubr.f32.vlgmr.msra.gmra.mrb[0].mxu1 %v208_v48 }
 0x21c   :  { %v506_v53 = vpop.f32.mrb[0].mxu1 }
 0x21d   :  { %v304_v54 = vadd.f32 %v506_v53, %v434_v52  ;;  %v298_v55 = vpop.f32.mrb[1].mxu1 }
 0x21e   :  { %v299_v56 = vadd.f32 %v434_v52, %v298_v55 }
 0x21f   :  { %v308_v58 = vmax.f32 %v304_v54, 0.0 }
 0x220   :  { %v307_v57 = vmax.f32 %v299_v56, 0.0 }
 0x222   :  { %539 = vmatprep.mubr.f32.mxu0 %v307_v57 }
 0x223   :  { %540 = vmatmul.mubr.f32.vlgmr.msra.gmra.mrb[4].mxu0 %v308_v58 }
 0x2f6   :  { %v541_v60 = vpop.f32.mrb[4].mxu0 }
 0x2f7   :  { %v404_v61 = vadd.f32 %v541_v60, %v435_v59  ;;  %v398_v62 = vpop.f32.mrb[5].mxu0 }
 0x2f8   :  { %v399_v63 = vadd.f32 %v435_v59, %v398_v62 }
 0x2f9   :  { %v408_v1 = vmax.f32 %v404_v61, 0.0 }
 0x2fa   :  { %v407_v2 = vmax.f32 %v399_v63, 0.0 }
 0x2fb   :  { %v412_v3 = vadd.f32 %v408_v1, %v203_v47 }
 0x2fc   :  { %v411_v4 = vadd.f32 %v407_v2, %v197_v42 }
 0x2fd   :  { %414 = vst [vmem:[#allocation11 + $0x8] sm:$0xff] %v412_v3 }
 0x2fe   :  { %413 = vst [vmem:[#allocation11] sm:$0xff] %v411_v4 }
 0x2ff   :  { %747 = shalt.err (!%p744_p8)
}
 0x300   :  { %s748_s12 = scalar_lea.hbm %s913_s7, 256 }
 0x301   :  { %p749_p9 = scmp.ne.s32.totalorder %s913_s7, %s748_s12  ;;  %p752_p10 = scmp.lt.u32.totalorder %s748_s12, %s913_s7 }
 0x303   :  { %p754_p11 = pnand %p752_p10, %p749_p9 }
 0x305   :  { %757 = shalt.err (!%p754_p11)
}
 0x306   :  { %426 = dma.vmem_to_hbm [thread:$0]  %s421_s10, 256, %s913_s7, [#allocation5], %s770_s1, %s770_s1, %s771_s25  }
 0x307   :  { %764 = dma.done.wait [#allocation5], 256  }
 0x308   :  { %765 = vsyncadd [#allocation5], 4294967040 }
 0x309   :  { %430 = vsyncpa [#allocation4], 1 }
 0x30a   :  { %431 = vsyncpa [#allocation7], 1 }
 0x30b   :  { %432 = vsyncpa [#allocation10], 1 }
 0x30c   :  { %433 = vsyncpa [#allocation5], 1 }

</bundles_post_ra>
